<compile_context>
chip_gen: v6e
topology: v6e:2x2x1
jax: 0.10.0
libtpu: 0.0.40
codegen_flags: <defaults>
</compile_context>

<pallas_src>
import functools

import jax
import jax.numpy as jnp
from jax.experimental import pallas as pl
from jax.experimental.pallas import tpu as pltpu


def _cdiv(a, b):
    return (a + b - 1) // b


def _round_up(v, m):
    return _cdiv(v, m) * m


def _vmem_budget_bytes():
    """Per-chip VMEM capacity minus headroom (fallback: 64 MiB chips)."""
    try:
        cap = int(pltpu.get_tpu_info().vmem_capacity_bytes)
    except Exception:
        cap = 64 << 20
    return max(cap - (8 << 20), 16 << 20)


def _choose_tiles(m, k, out_pad_base, rank, itemsize, vmem_budget):
    """Pick (tile_m, tile_n) to fit VMEM, minimize padding, and feed 2 TCs."""
    sublane = {4: 8, 2: 16, 1: 32}.get(itemsize, 8)
    # Generation-aware row cap: 512 on 64 MiB-VMEM chips (v7x), 1024 on 128 MiB.
    cap_m = 512 if vmem_budget <= (72 << 20) else 1024

    m_eff = max(m, sublane)
    # Choose tile_m so the tiles divide m as evenly as possible (minimal padding).
    n_m = max(1, _cdiv(m_eff, cap_m))
    tile_m = _round_up(_cdiv(m_eff, n_m), sublane)
    # Megacore: guarantee >= 2 grid steps on the parallel M axis when m allows.
    if _cdiv(m_eff, tile_m) < 2 and tile_m > sublane:
        tile_m = _round_up(_cdiv(tile_m, 2), sublane)

    # N tiling: bound the output / f32 intermediate tile; minimize N padding.
    cap_n = 2048
    n_n = max(1, _cdiv(out_pad_base, cap_n))
    tile_n = _round_up(_cdiv(out_pad_base, n_n), 128)

    def footprint(tm, tn):
        return (2 * tm * k * itemsize          # x tiles (double-buffered)
                + 2 * tm * tn * itemsize       # out tiles (double-buffered)
                + 2 * k * rank * itemsize      # down-weight buffers
                + 2 * rank * tn * itemsize     # up-weight tile buffers
                + tm * rank * 4                # f32 `down` intermediate
                + tm * tn * 4)                 # f32 `up` intermediate

    # Shrink tiles until the working set fits the per-chip budget.
    while footprint(tile_m, tile_n) > vmem_budget and (tile_m > sublane or tile_n > 128):
        if tile_m > sublane:
            tile_m = _round_up(_cdiv(tile_m, 2), sublane)
        else:
            tile_n = _round_up(_cdiv(tile_n, 2), 128)

    grid_m = _cdiv(m_eff, tile_m)
    grid_n = _cdiv(out_pad_base, tile_n)
    m_pad = grid_m * tile_m
    out_pad = grid_n * tile_n
    return tile_m, tile_n, grid_m, grid_n, m_pad, out_pad, footprint(tile_m, tile_n)


def _lora_kernel(x_ref, wdt_ref, wut_ref, o_ref, *, scale):
    # x_ref:   (tile_m, K)        native dtype
    # wdt_ref: (K, rank)          pre-transposed lora_down weight
    # wut_ref: (rank, tile_n)     pre-transposed (lane-padded) lora_up weight tile
    # o_ref:   (tile_m, tile_n)
    x = x_ref[...]
    down = jnp.dot(x, wdt_ref[...], preferred_element_type=jnp.float32)
    # Scale the tiny (tile_m, rank) intermediate, then cast back to the input
    # dtype so the second matmul runs the MXU in native mode (f32 accumulation
    # is kept via preferred_element_type). For f32 inputs the cast is a no-op.
    down = (scale * down).astype(x.dtype)
    up = jnp.dot(down, wut_ref[...], preferred_element_type=jnp.float32)
    o_ref[...] = up.astype(o_ref.dtype)


def lora_forward(x, w_down, w_up, *, rank, alpha):
    """x: [..., in_features] -> [..., out_features] via Pallas kernel.

    w_down: (rank, in_features), w_up: (out_features, rank)  (PyTorch layout).
    """
    in_features = x.shape[-1]
    out_features = w_up.shape[0]
    assert w_down.shape == (rank, in_features)
    assert w_up.shape == (out_features, rank)

    lead_shape = x.shape[:-1]
    m = 1
    for d in lead_shape:
        m *= d
    x2 = x.reshape(m, in_features)

    dtype = x.dtype
    itemsize = jnp.dtype(dtype).itemsize

    # ---- layout plumbing (one-time, outside the kernel) ----
    wd_t = w_down.astype(dtype).T   # (K, rank)
    wu_t = w_up.astype(dtype).T     # (rank, out_features)

    # Lane-dense, MXU-friendly output: pad out_features up to a multiple of 256.
    out_pad_base = _round_up(out_features, 256)

    budget = _vmem_budget_bytes()
    tile_m, tile_n, grid_m, grid_n, m_pad, out_pad, fp = _choose_tiles(
        m, in_features, out_pad_base, rank, itemsize, budget)

    if out_pad != out_features:
        wu_t = jnp.pad(wu_t, ((0, 0), (0, out_pad - out_features)))
    if m_pad != m:
        x2 = jnp.pad(x2, ((0, m_pad - m), (0, 0)))

    scale = float(alpha) / float(rank)
    kernel = functools.partial(_lora_kernel, scale=scale)

    vmem_limit = int(min(budget, max(fp + (4 << 20), 16 << 20)))

    # Advisory cost hint (padded shapes; this kernel is HBM-bandwidth bound).
    # The down projection is recomputed once per N tile; the up-weight tile is
    # re-fetched once per M tile (x and the down weight are not re-DMA'd).
    cost = pl.CostEstimate(
        flops=grid_n * 2 * m_pad * in_features * rank + 2 * m_pad * rank * out_pad,
        transcendentals=0,
        bytes_accessed=(m_pad * in_features * itemsize
                        + m_pad * out_pad * itemsize
                        + in_features * rank * itemsize
                        + grid_m * rank * out_pad * itemsize),
    )

    out2 = pl.pallas_call(
        kernel,
        out_shape=jax.ShapeDtypeStruct((m_pad, out_pad), dtype),
        grid=(grid_m, grid_n),                                   # N innermost
        in_specs=[
            pl.BlockSpec((tile_m, in_features), lambda i, j: (i, 0)),  # const over j
            pl.BlockSpec((in_features, rank), lambda i, j: (0, 0)),    # resident
            pl.BlockSpec((rank, tile_n), lambda i, j: (0, j)),
        ],
        out_specs=pl.BlockSpec((tile_m, tile_n), lambda i, j: (i, j)),
        compiler_params=pltpu.CompilerParams(
            dimension_semantics=("parallel", "parallel"),
            vmem_limit_bytes=vmem_limit,
        ),
        cost_estimate=cost,
    )(x2, wd_t, wu_t)

    out2 = out2[:m, :out_features]
    return out2.reshape(*lead_shape, out_features)


def lora_reference(x, w_down, w_up, *, rank, alpha):
    scale = alpha / rank
    y = jnp.einsum("...k,rk->...r", x.astype(jnp.float32), w_down.astype(jnp.float32))
    y = jnp.einsum("...r,or->...o", y, w_up.astype(jnp.float32))
    return (scale * y).astype(x.dtype)


if __name__ == "__main__":
    # Small shapes consistent with a GPT-2 LoRA-adapted linear: batch=2, seq=8, hidden=32.
    batch, seq, hidden = 2, 8, 32
    rank, alpha, out_features = 4, 8.0, 32

    key = jax.random.PRNGKey(0)
    kx, kd = jax.random.split(key)

    x = jax.random.normal(kx, (batch, seq, hidden), dtype=jnp.float32)

    # Deterministic parameter init mirroring the module's __init__:
    #   lora_down.weight ~ Normal(0, 0.01), shape (rank, in_features)
    #   lora_up.weight   = zeros,           shape (out_features, rank)
    w_down = 0.01 * jax.random.normal(kd, (rank, hidden), dtype=jnp.float32)
    w_up = jnp.zeros((out_features, rank), dtype=jnp.float32)

    out = lora_forward(x, w_down, w_up, rank=rank, alpha=alpha)
    out = jax.block_until_ready(out)
    ref = lora_reference(x, w_down, w_up, rank=rank, alpha=alpha)
    assert out.shape == (batch, seq, out_features)
    assert jnp.allclose(out, ref, atol=1e-5, rtol=1e-5)

    # Non-zero up-projection so the matmul path is exercised.
    w_up_nz = 0.02 * jax.random.normal(
        jax.random.PRNGKey(1), (out_features, rank), dtype=jnp.float32)
    out2 = jax.block_until_ready(lora_forward(x, w_down, w_up_nz, rank=rank, alpha=alpha))
    ref2 = lora_reference(x, w_down, w_up_nz, rank=rank, alpha=alpha)
    assert jnp.allclose(out2, ref2, atol=1e-5, rtol=1e-5)

    # Ragged out_features (not a multiple of 128/256) to exercise the N padding path.
    out_features3 = 160
    w_up3 = 0.02 * jax.random.normal(
        jax.random.PRNGKey(2), (out_features3, rank), dtype=jnp.float32)
    out3 = jax.block_until_ready(lora_forward(x, w_down, w_up3, rank=rank, alpha=alpha))
    ref3 = lora_reference(x, w_down, w_up3, rank=rank, alpha=alpha)
    assert out3.shape == (batch, seq, out_features3)
    assert jnp.allclose(out3, ref3, atol=1e-5, rtol=1e-5)

    print("KERNEL_OK")
</pallas_src>

<mosaic_0001>
module attributes {stable_mosaic.version = 11 : i64} {
  func.func @_lora_kernel(%arg0: i32, %arg1: i32, %arg2: memref<8x32xf32, #tpu.memory_space<vmem>>, %arg3: memref<32x4xf32, #tpu.memory_space<vmem>>, %arg4: memref<4x256xf32, #tpu.memory_space<vmem>>, %arg5: memref<8x256xf32, #tpu.memory_space<vmem>>) attributes {dimension_semantics = [#tpu.dimension_semantics<parallel>, #tpu.dimension_semantics<parallel>], iteration_bounds = array<i64: 2, 1>, scalar_prefetch = 0 : i64, scratch_operands = 0 : i64, tpu.core_type = #tpu.core_type<tc>, window_params = [{transform_indices = @transform_0, window_bounds = array<i64: 8, 32>}, {pipeline_mode = #tpu.pipeline_mode<synchronous>, transform_indices = @transform_1, window_bounds = array<i64: 32, 4>}, {transform_indices = @transform_2, window_bounds = array<i64: 4, 256>}, {transform_indices = @transform_3, window_bounds = array<i64: 8, 256>}]} {
    %c0 = arith.constant 0 : index
    %c0_0 = arith.constant 0 : index
    %0 = vector.load %arg2[%c0, %c0_0] : memref<8x32xf32, #tpu.memory_space<vmem>>, vector<8x32xf32>
    %c0_1 = arith.constant 0 : index
    %c0_2 = arith.constant 0 : index
    %1 = vector.load %arg3[%c0_1, %c0_2] : memref<32x4xf32, #tpu.memory_space<vmem>>, vector<32x4xf32>
    %cst = arith.constant dense<0.000000e+00> : vector<8x4xf32>
    %2 = tpu.matmul %0, %1, %cst {dimension_numbers = #tpu.dot_dimension_numbers<[1], [0], [0], [1], [0, 0, 1, 1], [], []>} : vector<8x32xf32>, vector<32x4xf32>, vector<8x4xf32> -> vector<8x4xf32>
    %cst_3 = arith.constant 2.000000e+00 : f32
    %3 = vector.broadcast %cst_3 : f32 to vector<8x4xf32>
    %4 = arith.mulf %3, %2 : vector<8x4xf32>
    %c0_4 = arith.constant 0 : index
    %c0_5 = arith.constant 0 : index
    %5 = vector.load %arg4[%c0_4, %c0_5] : memref<4x256xf32, #tpu.memory_space<vmem>>, vector<4x256xf32>
    %cst_6 = arith.constant dense<0.000000e+00> : vector<8x256xf32>
    %6 = tpu.matmul %4, %5, %cst_6 {dimension_numbers = #tpu.dot_dimension_numbers<[1], [0], [0], [1], [0, 0, 1, 1], [], []>} : vector<8x4xf32>, vector<4x256xf32>, vector<8x256xf32> -> vector<8x256xf32>
    %c0_7 = arith.constant 0 : index
    %c0_8 = arith.constant 0 : index
    %7 = vector.load %arg5[%c0_7, %c0_8] : memref<8x256xf32, #tpu.memory_space<vmem>>, vector<8x256xf32>
    tpu.vector_store %arg5[%c0_7, %c0_8], %6 {strides = array<i32>} : memref<8x256xf32, #tpu.memory_space<vmem>>, vector<8x256xf32>,
    return
  }
  func.func @transform_0(%arg0: i32, %arg1: i32) -> (i32, i32) {
    %c0_i32 = arith.constant 0 : i32
    %c0_i32_0 = arith.constant 0 : i32
    return %arg0, %c0_i32 : i32, i32
  }
  func.func @transform_1(%arg0: i32, %arg1: i32) -> (i32, i32) {
    %c0_i32 = arith.constant 0 : i32
    %c0_i32_0 = arith.constant 0 : i32
    %c0_i32_1 = arith.constant 0 : i32
    return %c0_i32, %c0_i32_0 : i32, i32
  }
  func.func @transform_2(%arg0: i32, %arg1: i32) -> (i32, i32) {
    %c0_i32 = arith.constant 0 : i32
    %c0_i32_0 = arith.constant 0 : i32
    return %c0_i32, %arg1 : i32, i32
  }
  func.func @transform_3(%arg0: i32, %arg1: i32) -> (i32, i32) {
    %c0_i32 = arith.constant 0 : i32
    return %arg0, %arg1 : i32, i32
  }
}

</mosaic_0001>

<bundles_post_ra>
// kernel: tpu_custom_call.1
= control target key start
LH: loop header
LB: loop body
LE: loop exit
PB: predicated region body
PF: predicated region fallthrough
CT: control target
= control target key end

     0   :  { %8 = vsyncpa [#allocation3], 0  ;;  %s783_s0 = inlined_call_operand.vmem [shape: f32[16,32], index: 0, kind: input, shape index: {}]   ;;  %s784_s1 = inlined_call_operand.vmem [shape: f32[32,4], index: 1, kind: input, shape index: {}]   ;;  %s785_s2 = inlined_call_operand.vmem [shape: f32[4,256], index: 2, kind: input, shape index: {}]   ;;  %s786_s3 = inlined_call_operand.hbm [shape: f32[16,256], index: 3, kind: output, shape index: {}]  }
   0x1   :  { %10 = vsyncpa [#allocation3 + $0x1], 0  ;;  %s663_s12 = smov 0   ;;  %s665_s13 = smov 0  }
   0x2   :  { %s667_s14 = smov 0   ;;  %s669_s15 = smov 0  }
   0x3   :  { %s671_s16 = smov 0   ;;  %s673_s17 = smov 0  }
   0x4 LB: > { %s470_s18 = sadd.s32 4294967295, %s638_s17   ;;  %s471_s19 = sadd.s32 4294967294, %s638_s17   ;;  %s638_s17 = sphi %s673_s17, %s16_s17   ;;  %s634_s16 = sphi %s671_s16, %s793_s16   ;;  %s630_s15 = sphi %s669_s15, %s792_s15   ;;  %s626_s14 = sphi %s667_s14, %s791_s14   ;;  %s622_s13 = sphi %s665_s13, %s790_s13   ;;  %s618_s12 = sphi %s663_s12, %s789_s12  }
   0x5   : > { %s28_s20 = sadd.s32 1, %s634_s16  ;;  %s110_s21 = sadd.s32 1, %s626_s14 }
   0x6   : > { %p30_p0 = scmp.ge.s32.totalorder %s28_s20, 2  ;;  %p120_p1 = scmp.ne.s32.totalorder %s626_s14, %s622_s13 }
   0x7   : > { %p121_p2 = scmp.eq.s32.totalorder %s470_s18, 1  ;;  %p126_p3 = scmp.ne.s32.totalorder %s622_s13, %s618_s12 }
   0x8   : > { %s795_s20 = smov (%p30_p0, %s28_s20), 0  ;;  %p127_p5 = scmp.eq.s32.totalorder %s471_s19, 1 }
   0x9   : > { %p703_p4 = por %p121_p2, %p120_p1  ;;  %s105_s23 = ssub.s32 %s634_s16, %s795_s20 }
   0xa   : > { %p475_p6 = scmp.ge.s32.totalorder %s638_s17, 1  ;;  %p108_p7 = scmp.eq.s32.totalorder %s105_s23, 0 }
   0xb   : > { %p710_p8 = por %p127_p5, %p126_p3  ;;  %p164_p9 = scmp.lt.s32.totalorder %s638_s17, 3 }
   0xc   : > { %s716_s25 = scalar_select %p108_p7, %s626_s14, %s110_s21  }
   0xd   : > { %p165_p10 = pnand %p475_p6, %p164_p9 }
   0xe   : > { %p192_p11 = scmp.lt.s32.totalorder (!%p165_p10), %s630_s15, 1  ;;  %s189_s21 = sand.u32 (!%p165_p10), 1, %s622_s13  }
   0xf   : > { %168 = sbr.rel (%p165_p10) target bundleno = 432 (0x1b0), region = 32  ;;  %s476_s23 = sshll.u32 (!%p165_p10), %s189_s21, 4 }
  0x10   : > { %s191_s26 = scalar_lea.vmem (!%p165_p10), [#allocation2], %s476_s23  ;;  %s487_s28 = sshll.u32 (!%p165_p10), %s630_s15, 8 }
  0x11   : > { %s385_s27 = sshll.u32 (!%p165_p10), %s191_s26, 4  ;;  %s383_s4 = scalar_lea.hbm (!%p165_p10), %s786_s3, %s487_s28  ;;  %s740_s27 = int_to_ptr.vmem [resolvable:$true] %s385_s27 }
  0x12   : > { %s369_s5 = scalar_lea.sflag (!%p165_p10), [#allocation3], %s189_s21 }
  0x14   : > { %v207_v0 = vld [vmem:[%s784_s1 + $0x18] sm:$0xff]  ;;  %v640_v1 = vmov 0.0   ;;  %v206_v2 = vld [vmem:[%s784_s1 + $0x10] sm:$0xff]  ;;  %vm641_vm0 = vmmov 0   ;;  %s193_s30 = scalar_select %p192_p11, %s630_s15, 1  ;;  %v205_v3 = vld [vmem:[%s784_s1 + $0x8] sm:$0xff] }
  0x15   : > { %493 = vmatprep.subr.mxu0 %v640_v1  ;;  %501 = vmatprep.mubr.msk.f32.mxu0 %vm641_vm0, %v640_v1  ;;  %v204_v4 = vld [vmem:[%s784_s1] sm:$0xff]  ;;  %vm208_vm1 = vcmask 261120   ;;  %vm290_vm2 = vcmask 1043456   ;;  %vm286_vm3 = vcmask 31744   ;;  %s642_s15 = smov [#allocation2]  }
  0x16   : > { %494 = vmatpush3.msra.mxu0 %v207_v0  ;;  %359 = vmatprep.mubr.f32.mxu1 %v640_v1  ;;  %s477_s6 = sshll.u32 %s193_s30, 3  ;;  %v283_v6 = vld [vmem:[%s785_s2] sm:$0xff]  ;;  %s566_s7 = sshll.u32 %s642_s15, 4  ;;  %s567_s7 = int_to_ptr.vmem [resolvable:$false] %s566_s7 }
  0x17   : > { %495 = vmatprep.subr.mxu0 %v640_v1  ;;  %s195_s11 = scalar_lea.vmem %s783_s0, %s477_s6  ;;  %v285_v7 = vcombine.high %v283_v6, %v283_v6  ;;  %s562_s6 = scalar_lea.vmem %s740_s27, 256 }
  0x18   : > { %496 = vmatpush3.msra.mxu0 %v206_v2  ;;  %v203_v5 = vld [vmem:[%s195_s11] sm:$0xff]  ;;  %p563_p12 = scmp.ne.s32.totalorder %s740_s27, %s562_s6  ;;  %s568_s8 = scalar_lea.vmem %s567_s7, 512 }
  0x19   : > { %497 = vmatprep.subr.mxu0 %v640_v1  ;;  %479 = vmatprep.subr.msk.mxu1 %vm290_vm2, %v285_v7  ;;  %p569_p1 = scmp.lt.s32.totalorder %s740_s27, %s567_s7  ;;  %p570_p2 = scmp.lt.s32.totalorder %s568_s8, %s562_s6 }
  0x1a   : > { %498 = vmatpush3.msra.mxu0 %v205_v3  ;;  %480 = vmatpush1.msk.msra.mxu1 %vm290_vm2, %v283_v6  ;;  %p564_p13 = pnand %p563_p12, %p703_p4 }
  0x1b   : > { %499 = vmatprep.subr.mxu0 %v640_v1  ;;  %p571_p3 = por %p570_p2, %p569_p1 }
  0x1c   : > { %500 = vmatpush3.msra.mxu0 %v204_v4  ;;  %p565_p0 = pneg %p564_p13 }
  0x1d   : > { %502 = vmatmul.mubr.msk.f32.vlgmr.msra.gmra.mxu0 %vm208_vm1, %v203_v5 }
  0x1e   : > { %p572_p5 = pnand %p571_p3, %p565_p0 }
  0xdd   : > { %v278_v8 = vpop.f32.mrf.mxu0 }
  0xde   : > { %v282_v9 = vmul.f32 2.0, %v278_v8 }
  0xdf   : > { %v503_v10 = vpop.f32.mrf.mxu0 }
  0xe0   : > { %481 = vmatmul.mubr.msk.f32.vlgmr.msra.gmra.mxu1 %vm286_vm3, %v282_v9 }
 0x1a0   : > { %v361_v11 = vpop.f32.mrf.mxu1 }
 0x1a1   : > { %366 = vst [vmem:[%s191_s26] sm:$0xff] %v361_v11 }
 0x1a2   : > { %v363_v12 = vpop.f32.mrf.mxu1 }
 0x1a3   : > { %367 = vst [vmem:[%s191_s26 + $0x8] sm:$0xff] %v363_v12 }
 0x1a4   : > { %575 = shalt.err (!%p572_p5)
}
 0x1a5   : > { %s576_s9 = scalar_lea.hbm %s383_s4, 256  ;;  %s580_s18 = scalar_lea.hbm %s786_s3, 512 }
 0x1a6   : > { %p577_p6 = scmp.ne.s32.totalorder %s383_s4, %s576_s9  ;;  %p581_p10 = scmp.lt.s32.totalorder %s383_s4, %s786_s3 }
 0x1a7   : > { %p582_p11 = scmp.lt.s32.totalorder %s580_s18, %s576_s9 }
 0x1a8   : > { %p578_p7 = pnand %p577_p6, %p703_p4 }
 0x1a9   : > { %p583_p12 = por %p582_p11, %p581_p10 }
 0x1aa   : > { %p579_p9 = pneg %p578_p7 }
 0x1ac   : > { %p584_p13 = pnand %p583_p12, %p579_p9 }
 0x1ae   : > { %587 = shalt.err (!%p584_p13)
}
 0x1af   : > { %504 = dma.vmem_to_hbm [thread:$0]  (%p703_p4), %s740_s27, 256, %s383_s4, %s369_s5  }
 0x1b0 PF: > { %p510_p0 = scmp.ge.s32.totalorder %s638_s17, 2  ;;  %s397_s23 = sand.u32 1, %s618_s12  }
 0x1b1   : > { %s398_s26 = scalar_lea.sflag [#allocation3], %s397_s23 }
 0x1b2   : > { %p507_p1 = pnand %p510_p0, %p710_p8 }
 0x1b4   : > { %p508_p2 = pneg %p507_p1 }
 0x1b6   : > { %613 = dma.done.wait (%p508_p2), %s398_s26, 256  }
 0x1b7   : > { %615 = vsyncadd (%p508_p2), %s398_s26, 4294967040  ;;  %s16_s17 = sadd.s32 1, %s638_s17   ;;  %s789_s12 = smov %s622_s13 }
 0x1b8   : > { %p13_p3 = scmp.ge.s32.totalorder %s16_s17, 4   ;;  %s790_s13 = smov %s626_s14 }
 0x1b9   : > { %s791_s14 = smov %s716_s25  ;;  %s792_s15 = smov %s634_s16 }
 0x1ba   : > { %s793_s16 = smov %s795_s20  ;;  %15 = sbr.rel (!%p13_p3) target bundleno = 4 (0x4), region = 70 }
 0x1bf   :  { %403 = vsyncpa [#allocation3], 1 }
 0x1c0   :  { %405 = vsyncpa [#allocation3 + $0x1], 1 }

</bundles_post_ra>
